<compile_context>
chip_gen: v7x
topology: tpu7x:2x2x1
jax: 0.10.0
libtpu: 0.0.40
codegen_flags: <defaults>
</compile_context>

<pallas_src>
import jax
import jax.numpy as jnp
from jax.experimental import pallas as pl
from jax.experimental.pallas import tpu as pltpu


# ------------------------------- kernels -----------------------------------


def _aff_fused_kernel(x_ref, r_ref, w1_ref, b1_ref, w2_ref, b2_ref,
                      wg1_ref, bg1_ref, wg2_ref, bg2_ref, o_ref):
    """One batch per grid step; whole (C, S) block resident in VMEM.

    Blocks (lane axis = spatial):
      x_ref, r_ref, o_ref : (1, C, S)
      w1_ref (Cr, C), b1_ref (Cr, 1)   local conv1 (BN1 scale/bias folded)
      w2_ref (C, Cr), b2_ref (C, 1)    local conv2 (BN2 scale/bias folded)
      wg1_ref (C, Cr), bg1_ref (1, Cr) global conv1 (folded, f32)
      wg2_ref (C, Cr), bg2_ref (C, 1)  global conv2 (folded, f32)
    """
    x = x_ref[0]                                                      # (C, S)
    r = r_ref[0]
    xa = x + r

    # ---- global branch: on-chip pooled mean + tiny MLP (no extra HBM pass).
    # Matvecs done as broadcast-multiply + reduce: no transposes, no N=1 matmul.
    xa32 = xa.astype(jnp.float32)
    inv_s = 1.0 / xa.shape[-1]
    pooled = jnp.sum(xa32, axis=1, keepdims=True) * inv_s             # (C, 1)
    hg = jnp.sum(wg1_ref[...] * pooled, axis=0, keepdims=True)        # (1, Cr)
    hg = jnp.maximum(hg + bg1_ref[...], 0.0)
    xg = jnp.sum(wg2_ref[...] * hg, axis=1, keepdims=True) + bg2_ref[...]  # (C, 1)

    # ---- local branch: 1x1 convs as MXU matmuls, f32 accumulation.
    h = jnp.dot(w1_ref[...], xa, preferred_element_type=jnp.float32)  # (Cr, S)
    h = jnp.maximum(h + b1_ref[...], 0.0)
    xl = jnp.dot(w2_ref[...], h.astype(w2_ref.dtype),
                 preferred_element_type=jnp.float32)                  # (C, S)

    # ---- sigmoid (exp on EUP) + simplified fuse: 2*(r + (x-r)*w).
    z = xl + (b2_ref[...] + xg)
    # approx=False keeps ~1e-7 parity with the f32 reference; flip to True if
    # a profile ever shows the VALU slot binding (this kernel is HBM-bound).
    wgt = pl.reciprocal(1.0 + jnp.exp(-z), approx=False)
    rf = r.astype(jnp.float32)
    out = 2.0 * (rf + (x.astype(jnp.float32) - rf) * wgt)
    o_ref[0] = out.astype(o_ref.dtype)


def _aff_tiled_kernel(x_ref, r_ref, bxg_ref, w1_ref, b1_ref, w2_ref, o_ref):
    """Fallback: one (batch, spatial-tile) per grid step; ragged last tile OK.

    Blocks:
      x_ref, r_ref, o_ref : (1, C, TS)
      bxg_ref             : (1, C, 1)  per-batch folded BN2 bias + global xg
      w1_ref (Cr, C), b1_ref (Cr, 1), w2_ref (C, Cr)
    """
    x = x_ref[0]
    r = r_ref[0]
    xa = x + r

    h = jnp.dot(w1_ref[...], xa, preferred_element_type=jnp.float32)  # (Cr, TS)
    h = jnp.maximum(h + b1_ref[...], 0.0)
    xl = jnp.dot(w2_ref[...], h.astype(w2_ref.dtype),
                 preferred_element_type=jnp.float32)                  # (C, TS)

    z = xl + bxg_ref[0]
    wgt = pl.reciprocal(1.0 + jnp.exp(-z), approx=False)
    rf = r.astype(jnp.float32)
    out = 2.0 * (rf + (x.astype(jnp.float32) - rf) * wgt)
    o_ref[0] = out.astype(o_ref.dtype)


# ------------------------------- wrapper ------------------------------------


def _fold_bn(gamma, beta, mean, var, conv_bias=None, eps=1e-5):
    """Inference-mode BN folded over `conv_out + conv_bias`."""
    s = gamma / jnp.sqrt(var + eps)
    cb = 0.0 if conv_bias is None else conv_bias
    b = beta + s * (cb - mean)
    return s, b                                   # 1-D (C,)


def _hw_budget():
    """Generation-aware VMEM / tile budgets (v7x has half the VMEM of v5e/v6e)."""
    vmem_bytes = 64 << 20                         # conservative default (v7x-class)
    try:
        info = pltpu.get_tpu_info()
        vmem_bytes = int(getattr(info, "vmem_capacity_bytes", vmem_bytes))
    except Exception:
        pass
    if vmem_bytes >= (96 << 20):                  # v5e / v6e: 128 MiB physical VMEM
        return {"vmem_limit": 80 << 20, "block_bytes": 4 << 20, "fused_budget": 56 << 20}
    # v7x-class (64 MiB VMEM, higher HBM BW): keep blocks modest to avoid spills.
    return {"vmem_limit": 40 << 20, "block_bytes": 2 << 20, "fused_budget": 24 << 20}


def _choose_tile_s(S, C, itemsize, block_bytes, min_spatial_steps):
    """Fixed lane-dense spatial tile (multiple of 128); never collapses to S."""
    lanes = (block_bytes // max(1, C * itemsize)) // 128 * 128
    lanes = max(128, lanes)
    s_padded = pl.cdiv(S, 128) * 128
    lanes = min(lanes, s_padded)
    # Keep enough grid steps so both v7x TensorCores get work.
    while min_spatial_steps > 1 and pl.cdiv(S, lanes) < min_spatial_steps and lanes > 128:
        lanes -= 128
    return int(lanes)


def aff_forward(x_nchw, res_nchw, params, *, path=None, tile_s=None):
    """AFF forward. x/residual: (N, C, H, W). Returns (N, C, H, W).

    path: None (auto), "fused" (single-pass per-batch kernel) or "tiled"
          (spatially tiled fallback for per-batch blocks too big for VMEM).
    """
    N, C, H, W = x_nchw.shape
    S = H * W
    Cr = params["w1l"].shape[1]
    dtype = x_nchw.dtype
    itemsize = jnp.dtype(dtype).itemsize

    # Free reshape: channel-major (N, C, S); spatial is the lane axis.
    x = x_nchw.reshape(N, C, S)
    r = res_nchw.reshape(N, C, S)

    # Fold BN (inference mode) + conv bias into per-channel scale / bias.
    s1l, b1l = _fold_bn(params["bn1l_g"], params["bn1l_b"], params["bn1l_m"],
                        params["bn1l_v"], params.get("cb1l"))
    s2l, b2l = _fold_bn(params["bn2l_g"], params["bn2l_b"], params["bn2l_m"],
                        params["bn2l_v"], params.get("cb2l"))
    s1g, b1g = _fold_bn(params["bn1g_g"], params["bn1g_b"], params["bn1g_m"],
                        params["bn1g_v"], params.get("cb1g"))
    s2g, b2g = _fold_bn(params["bn2g_g"], params["bn2g_b"], params["bn2g_m"],
                        params["bn2g_v"], params.get("cb2g"))

    # Local-branch weights in (C,S)-layout orientation, BN scale folded in.
    # TODO(synk): for very large C on v6e/v7x, cast xa/h/w1/w2 to bf16 for the
    # MXU; kept in the input dtype here to preserve f32 parity while HBM-bound.
    w1 = (s1l[:, None] * params["w1l"].T).astype(dtype)            # (Cr, C)
    b1 = b1l[:, None].astype(jnp.float32)                          # (Cr, 1)
    w2 = (s2l[:, None] * params["w2l"].T).astype(dtype)            # (C, Cr)
    b2 = b2l[:, None].astype(jnp.float32)                          # (C, 1)

    # Global-branch weights (tiny), kept f32; orientation chosen so the
    # in-kernel matvecs are broadcast-multiply + reduce.
    wg1 = (params["w1g"] * s1g[None, :]).astype(jnp.float32)       # (C, Cr)
    bg1 = b1g[None, :].astype(jnp.float32)                         # (1, Cr)
    wg2 = (params["w2g"].T * s2g[:, None]).astype(jnp.float32)     # (C, Cr)
    bg2 = b2g[:, None].astype(jnp.float32)                         # (C, 1)

    budget = _hw_budget()

    if path is None:
        # Fused-path VMEM estimate: x/r/out blocks double-buffered plus ~4 f32
        # (C,S) intermediates inside the body.
        fused_bytes = 6 * C * S * itemsize + 4 * C * S * 4
        path = "fused" if fused_bytes <= budget["fused_budget"] else "tiled"

    if path == "fused":
        row_spec = pl.BlockSpec((1, C, S), lambda b: (b, 0, 0))

        def cspec(shape):
            return pl.BlockSpec(shape, lambda b: (0,) * len(shape))

        out = pl.pallas_call(
            _aff_fused_kernel,
            out_shape=jax.ShapeDtypeStruct((N, C, S), dtype),
            grid=(N,),
            in_specs=[row_spec, row_spec,
                      cspec((Cr, C)), cspec((Cr, 1)), cspec((C, Cr)), cspec((C, 1)),
                      cspec((C, Cr)), cspec((1, Cr)), cspec((C, Cr)), cspec((C, 1))],
            out_specs=row_spec,
            compiler_params=pltpu.CompilerParams(
                dimension_semantics=("parallel",),
                vmem_limit_bytes=budget["vmem_limit"],
            ),
        )(x, r, w1, b1, w2, b2, wg1, bg1, wg2, bg2)
        return out.reshape(N, C, H, W)

    # ---- tiled fallback: per-batch block too big to keep resident in VMEM ----
    # Global branch (tiny (N,C) math) computed in the wrapper, f32-accumulated.
    # TODO(synk): this path re-reads x/r from HBM for the pooled reduction
    # (~5 HBM passes); it is only taken when the fused path cannot fit VMEM.
    pooled = jnp.mean(x.astype(jnp.float32) + r.astype(jnp.float32), axis=2)   # (N, C)
    hg = jnp.maximum(pooled @ wg1 + bg1, 0.0)                                  # (N, Cr)
    xg = hg @ wg2.T + bg2[:, 0][None, :]                                       # (N, C)
    bxg = (b2[:, 0][None, :] + xg)[:, :, None].astype(jnp.float32)             # (N, C, 1)

    if tile_s is None:
        min_spatial_steps = 2 if N == 1 else 1      # keep both v7x TCs busy
        tile_s = _choose_tile_s(S, C, itemsize, budget["block_bytes"], min_spatial_steps)
    grid = (N, pl.cdiv(S, tile_s))                  # ragged last tile: store is masked

    row_spec = pl.BlockSpec((1, C, tile_s), lambda b, s: (b, 0, s))
    bxg_spec = pl.BlockSpec((1, C, 1), lambda b, s: (b, 0, 0))

    def const_spec(shape):
        return pl.BlockSpec(shape, lambda b, s: (0,) * len(shape))

    out = pl.pallas_call(
        _aff_tiled_kernel,
        out_shape=jax.ShapeDtypeStruct((N, C, S), dtype),
        grid=grid,
        in_specs=[row_spec, row_spec, bxg_spec,
                  const_spec((Cr, C)), const_spec((Cr, 1)), const_spec((C, Cr))],
        out_specs=row_spec,
        compiler_params=pltpu.CompilerParams(
            dimension_semantics=("parallel", "parallel"),
            vmem_limit_bytes=budget["vmem_limit"],
        ),
    )(x, r, bxg, w1, b1, w2)
    return out.reshape(N, C, H, W)


# --------------------------- params / reference ------------------------------


def init_params(key, channels, reduction=4):
    """Deterministic synthetic parameters matching the PyTorch module shapes."""
    inter = channels // reduction
    ks = jax.random.split(key, 24)

    def conv_w(k, cin, cout):
        # PyTorch Conv2d weight (cout, cin, 1, 1); stored as (cin, cout).
        return jax.random.normal(k, (cin, cout), jnp.float32) * 0.1

    def conv_b(k, c):
        return 0.05 * jax.random.normal(k, (c,), jnp.float32)

    def bn(kg, kb, km, kv, c):
        gamma = 1.0 + 0.05 * jax.random.normal(kg, (c,), jnp.float32)
        beta = 0.05 * jax.random.normal(kb, (c,), jnp.float32)
        mean = 0.05 * jax.random.normal(km, (c,), jnp.float32)
        var = 0.9 + 0.2 * jax.random.uniform(kv, (c,), jnp.float32)
        return gamma, beta, mean, var

    p = {}
    p["w1l"] = conv_w(ks[0], channels, inter)
    p["w2l"] = conv_w(ks[1], inter, channels)
    p["w1g"] = conv_w(ks[2], channels, inter)
    p["w2g"] = conv_w(ks[3], inter, channels)
    p["cb1l"] = conv_b(ks[4], inter)
    p["cb2l"] = conv_b(ks[5], channels)
    p["cb1g"] = conv_b(ks[6], inter)
    p["cb2g"] = conv_b(ks[7], channels)
    p["bn1l_g"], p["bn1l_b"], p["bn1l_m"], p["bn1l_v"] = bn(ks[8], ks[9], ks[10], ks[11], inter)
    p["bn2l_g"], p["bn2l_b"], p["bn2l_m"], p["bn2l_v"] = bn(ks[12], ks[13], ks[14], ks[15], channels)
    p["bn1g_g"], p["bn1g_b"], p["bn1g_m"], p["bn1g_v"] = bn(ks[16], ks[17], ks[18], ks[19], inter)
    p["bn2g_g"], p["bn2g_b"], p["bn2g_m"], p["bn2g_v"] = bn(ks[20], ks[21], ks[22], ks[23], channels)
    return p


def aff_reference(x, r, params):
    """Pure-JAX reference (explicit conv-bias + BatchNorm) for sanity checking."""
    N, C, H, W = x.shape
    xf = jnp.transpose(x, (0, 2, 3, 1)).reshape(N, H * W, C).astype(jnp.float32)
    rf = jnp.transpose(r, (0, 2, 3, 1)).reshape(N, H * W, C).astype(jnp.float32)
    xa = xf + rf

    def bn(u, g, b, m, v, eps=1e-5):
        return (u - m) / jnp.sqrt(v + eps) * g + b

    def att(inp, w1, cb1, bn1, w2, cb2, bn2):
        h = jnp.maximum(bn(inp @ w1 + cb1, *bn1), 0.0)
        return bn(h @ w2 + cb2, *bn2)

    bn1l = (params["bn1l_g"], params["bn1l_b"], params["bn1l_m"], params["bn1l_v"])
    bn2l = (params["bn2l_g"], params["bn2l_b"], params["bn2l_m"], params["bn2l_v"])
    bn1g = (params["bn1g_g"], params["bn1g_b"], params["bn1g_m"], params["bn1g_v"])
    bn2g = (params["bn2g_g"], params["bn2g_b"], params["bn2g_m"], params["bn2g_v"])

    xl = att(xa, params["w1l"], params["cb1l"], bn1l, params["w2l"], params["cb2l"], bn2l)
    pooled = jnp.mean(xa, axis=1, keepdims=True)
    xg = att(pooled, params["w1g"], params["cb1g"], bn1g, params["w2g"], params["cb2g"], bn2g)
    w = jax.nn.sigmoid(xl + xg)
    out = 2.0 * xf * w + 2.0 * rf * (1.0 - w)
    return jnp.transpose(out.reshape(N, H, W, C), (0, 3, 1, 2)).astype(x.dtype)


if __name__ == "__main__":
    channels, reduction = 16, 4
    key = jax.random.PRNGKey(0)
    kx, kr, kp = jax.random.split(key, 3)
    params = init_params(kp, channels, reduction)

    # Case 1: auto path (fused single-pass kernel), even spatial size.
    N, H, W = 2, 16, 16
    x = jax.random.normal(kx, (N, channels, H, W), jnp.float32)
    residual = jax.random.normal(kr, (N, channels, H, W), jnp.float32)
    out = jax.block_until_ready(aff_forward(x, residual, params))
    ref = aff_reference(x, residual, params)
    assert out.shape == (N, channels, H, W)
    assert jnp.allclose(out, ref, atol=2e-4, rtol=2e-4), "fused path mismatch vs reference"

    # Case 2: tiled fallback with a ragged last spatial tile (H*W = 196, tile 128).
    H2 = W2 = 14
    x2 = jax.random.normal(kx, (N, channels, H2, W2), jnp.float32)
    r2 = jax.random.normal(kr, (N, channels, H2, W2), jnp.float32)
    out2 = jax.block_until_ready(aff_forward(x2, r2, params, path="tiled", tile_s=128))
    ref2 = aff_reference(x2, r2, params)
    assert out2.shape == (N, channels, H2, W2)
    assert jnp.allclose(out2, ref2, atol=2e-4, rtol=2e-4), "tiled path mismatch vs reference"

    print("KERNEL_OK")
</pallas_src>

<mosaic_0001>
module attributes {stable_mosaic.version = 11 : i64} {
  func.func @_aff_fused_kernel(%arg0: i32, %arg1: memref<1x16x256xf32, #tpu.memory_space<vmem>>, %arg2: memref<1x16x256xf32, #tpu.memory_space<vmem>>, %arg3: memref<4x16xf32, #tpu.memory_space<vmem>>, %arg4: memref<4x1xf32, #tpu.memory_space<vmem>>, %arg5: memref<16x4xf32, #tpu.memory_space<vmem>>, %arg6: memref<16x1xf32, #tpu.memory_space<vmem>>, %arg7: memref<16x4xf32, #tpu.memory_space<vmem>>, %arg8: memref<1x4xf32, #tpu.memory_space<vmem>>, %arg9: memref<16x4xf32, #tpu.memory_space<vmem>>, %arg10: memref<16x1xf32, #tpu.memory_space<vmem>>, %arg11: memref<1x16x256xf32, #tpu.memory_space<vmem>>) attributes {dimension_semantics = [#tpu.dimension_semantics<parallel>], iteration_bounds = array<i64: 2>, scalar_prefetch = 0 : i64, scratch_operands = 0 : i64, tpu.core_type = #tpu.core_type<tc>, window_params = [{transform_indices = @transform_0, window_bounds = array<i64: 1, 16, 256>}, {transform_indices = @transform_1, window_bounds = array<i64: 1, 16, 256>}, {pipeline_mode = #tpu.pipeline_mode<synchronous>, transform_indices = @transform_2, window_bounds = array<i64: 4, 16>}, {pipeline_mode = #tpu.pipeline_mode<synchronous>, transform_indices = @transform_3, window_bounds = array<i64: 4, 1>}, {pipeline_mode = #tpu.pipeline_mode<synchronous>, transform_indices = @transform_4, window_bounds = array<i64: 16, 4>}, {pipeline_mode = #tpu.pipeline_mode<synchronous>, transform_indices = @transform_5, window_bounds = array<i64: 16, 1>}, {pipeline_mode = #tpu.pipeline_mode<synchronous>, transform_indices = @transform_6, window_bounds = array<i64: 16, 4>}, {pipeline_mode = #tpu.pipeline_mode<synchronous>, transform_indices = @transform_7, window_bounds = array<i64: 1, 4>}, {pipeline_mode = #tpu.pipeline_mode<synchronous>, transform_indices = @transform_8, window_bounds = array<i64: 16, 4>}, {pipeline_mode = #tpu.pipeline_mode<synchronous>, transform_indices = @transform_9, window_bounds = array<i64: 16, 1>}, {transform_indices = @transform_10, window_bounds = array<i64: 1, 16, 256>}]} {
    %c0 = arith.constant 0 : index
    %c0_0 = arith.constant 0 : index
    %c0_1 = arith.constant 0 : index
    %0 = vector.load %arg1[%c0, %c0_0, %c0_1] : memref<1x16x256xf32, #tpu.memory_space<vmem>>, vector<1x16x256xf32>
    %1 = vector.shape_cast %0 : vector<1x16x256xf32> to vector<16x256xf32>
    %c0_2 = arith.constant 0 : index
    %c0_3 = arith.constant 0 : index
    %c0_4 = arith.constant 0 : index
    %2 = vector.load %arg2[%c0_2, %c0_3, %c0_4] : memref<1x16x256xf32, #tpu.memory_space<vmem>>, vector<1x16x256xf32>
    %3 = vector.shape_cast %2 : vector<1x16x256xf32> to vector<16x256xf32>
    %4 = arith.addf %1, %3 : vector<16x256xf32>
    %cst = arith.constant dense<0.000000e+00> : vector<16xf32>
    %5 = vector.multi_reduction <add>, %4, %cst [1] : vector<16x256xf32> to vector<16xf32>
    %6 = vector.shape_cast %5 : vector<16xf32> to vector<16x1xf32>
    %cst_5 = arith.constant 3.906250e-03 : f32
    %7 = vector.broadcast %cst_5 : f32 to vector<16x1xf32>
    %8 = arith.mulf %6, %7 : vector<16x1xf32>
    %c0_6 = arith.constant 0 : index
    %c0_7 = arith.constant 0 : index
    %9 = vector.load %arg7[%c0_6, %c0_7] : memref<16x4xf32, #tpu.memory_space<vmem>>, vector<16x4xf32>
    %10 = vector.broadcast %8 : vector<16x1xf32> to vector<16x4xf32>
    %11 = arith.mulf %9, %10 : vector<16x4xf32>
    %cst_8 = arith.constant dense<0.000000e+00> : vector<4xf32>
    %12 = vector.multi_reduction <add>, %11, %cst_8 [0] : vector<16x4xf32> to vector<4xf32>
    %13 = vector.shape_cast %12 : vector<4xf32> to vector<1x4xf32>
    %c0_9 = arith.constant 0 : index
    %c0_10 = arith.constant 0 : index
    %14 = vector.load %arg8[%c0_9, %c0_10] : memref<1x4xf32, #tpu.memory_space<vmem>>, vector<1x4xf32>
    %15 = arith.addf %13, %14 : vector<1x4xf32>
    %cst_11 = arith.constant 0.000000e+00 : f32
    %16 = vector.broadcast %cst_11 : f32 to vector<1x4xf32>
    %17 = arith.maximumf %15, %16 : vector<1x4xf32>
    %c0_12 = arith.constant 0 : index
    %c0_13 = arith.constant 0 : index
    %18 = vector.load %arg9[%c0_12, %c0_13] : memref<16x4xf32, #tpu.memory_space<vmem>>, vector<16x4xf32>
    %19 = vector.broadcast %17 : vector<1x4xf32> to vector<16x4xf32>
    %20 = arith.mulf %18, %19 : vector<16x4xf32>
    %cst_14 = arith.constant dense<0.000000e+00> : vector<16xf32>
    %21 = vector.multi_reduction <add>, %20, %cst_14 [1] : vector<16x4xf32> to vector<16xf32>
    %22 = vector.shape_cast %21 : vector<16xf32> to vector<16x1xf32>
    %c0_15 = arith.constant 0 : index
    %c0_16 = arith.constant 0 : index
    %23 = vector.load %arg10[%c0_15, %c0_16] : memref<16x1xf32, #tpu.memory_space<vmem>>, vector<16x1xf32>
    %24 = arith.addf %22, %23 : vector<16x1xf32>
    %c0_17 = arith.constant 0 : index
    %c0_18 = arith.constant 0 : index
    %25 = vector.load %arg3[%c0_17, %c0_18] : memref<4x16xf32, #tpu.memory_space<vmem>>, vector<4x16xf32>
    %cst_19 = arith.constant dense<0.000000e+00> : vector<4x256xf32>
    %26 = tpu.matmul %25, %4, %cst_19 {dimension_numbers = #tpu.dot_dimension_numbers<[1], [0], [0], [1], [0, 0, 1, 1], [], []>} : vector<4x16xf32>, vector<16x256xf32>, vector<4x256xf32> -> vector<4x256xf32>
    %c0_20 = arith.constant 0 : index
    %c0_21 = arith.constant 0 : index
    %27 = vector.load %arg4[%c0_20, %c0_21] : memref<4x1xf32, #tpu.memory_space<vmem>>, vector<4x1xf32>
    %28 = vector.broadcast %27 : vector<4x1xf32> to vector<4x256xf32>
    %29 = arith.addf %26, %28 : vector<4x256xf32>
    %cst_22 = arith.constant 0.000000e+00 : f32
    %30 = vector.broadcast %cst_22 : f32 to vector<4x256xf32>
    %31 = arith.maximumf %29, %30 : vector<4x256xf32>
    %c0_23 = arith.constant 0 : index
    %c0_24 = arith.constant 0 : index
    %32 = vector.load %arg5[%c0_23, %c0_24] : memref<16x4xf32, #tpu.memory_space<vmem>>, vector<16x4xf32>
    %cst_25 = arith.constant dense<0.000000e+00> : vector<16x256xf32>
    %33 = tpu.matmul %32, %31, %cst_25 {dimension_numbers = #tpu.dot_dimension_numbers<[1], [0], [0], [1], [0, 0, 1, 1], [], []>} : vector<16x4xf32>, vector<4x256xf32>, vector<16x256xf32> -> vector<16x256xf32>
    %c0_26 = arith.constant 0 : index
    %c0_27 = arith.constant 0 : index
    %34 = vector.load %arg6[%c0_26, %c0_27] : memref<16x1xf32, #tpu.memory_space<vmem>>, vector<16x1xf32>
    %35 = arith.addf %34, %24 : vector<16x1xf32>
    %36 = vector.broadcast %35 : vector<16x1xf32> to vector<16x256xf32>
    %37 = arith.addf %33, %36 : vector<16x256xf32>
    %cst_28 = arith.constant 0.000000e+00 : f32
    %38 = vector.broadcast %cst_28 : f32 to vector<16x256xf32>
    %39 = arith.subf %38, %37 : vector<16x256xf32>
    %40 = math.exp %39 : vector<16x256xf32>
    %cst_29 = arith.constant 1.000000e+00 : f32
    %41 = vector.broadcast %cst_29 : f32 to vector<16x256xf32>
    %42 = arith.addf %41, %40 : vector<16x256xf32>
    %43 = tpu.reciprocal %42 : vector<16x256xf32> -> vector<16x256xf32>
    %44 = arith.subf %1, %3 : vector<16x256xf32>
    %45 = arith.mulf %44, %43 : vector<16x256xf32>
    %46 = arith.addf %3, %45 : vector<16x256xf32>
    %cst_30 = arith.constant 2.000000e+00 : f32
    %47 = vector.broadcast %cst_30 : f32 to vector<16x256xf32>
    %48 = arith.mulf %47, %46 : vector<16x256xf32>
    %c0_31 = arith.constant 0 : index
    %c0_32 = arith.constant 0 : index
    %c0_33 = arith.constant 0 : index
    %49 = vector.load %arg11[%c0_31, %c0_32, %c0_33] : memref<1x16x256xf32, #tpu.memory_space<vmem>>, vector<1x16x256xf32>
    %50 = vector.shape_cast %49 : vector<1x16x256xf32> to vector<16x256xf32>
    %51 = vector.shape_cast %48 : vector<16x256xf32> to vector<1x16x256xf32>
    tpu.vector_store %arg11[%c0_31, %c0_32, %c0_33], %51 {strides = array<i32>} : memref<1x16x256xf32, #tpu.memory_space<vmem>>, vector<1x16x256xf32>,
    return
  }
  func.func @transform_0(%arg0: i32) -> (i32, i32, i32) {
    %c0_i32 = arith.constant 0 : i32
    %c0_i32_0 = arith.constant 0 : i32
    %c0_i32_1 = arith.constant 0 : i32
    return %arg0, %c0_i32, %c0_i32_0 : i32, i32, i32
  }
  func.func @transform_1(%arg0: i32) -> (i32, i32, i32) {
    %c0_i32 = arith.constant 0 : i32
    %c0_i32_0 = arith.constant 0 : i32
    %c0_i32_1 = arith.constant 0 : i32
    return %arg0, %c0_i32, %c0_i32_0 : i32, i32, i32
  }
  func.func @transform_2(%arg0: i32) -> (i32, i32) {
    %c0_i32 = arith.constant 0 : i32
    %c0_i32_0 = arith.constant 0 : i32
    %c0_i32_1 = arith.constant 0 : i32
    return %c0_i32, %c0_i32_0 : i32, i32
  }
  func.func @transform_3(%arg0: i32) -> (i32, i32) {
    %c0_i32 = arith.constant 0 : i32
    %c0_i32_0 = arith.constant 0 : i32
    %c0_i32_1 = arith.constant 0 : i32
    return %c0_i32, %c0_i32_0 : i32, i32
  }
  func.func @transform_4(%arg0: i32) -> (i32, i32) {
    %c0_i32 = arith.constant 0 : i32
    %c0_i32_0 = arith.constant 0 : i32
    %c0_i32_1 = arith.constant 0 : i32
    return %c0_i32, %c0_i32_0 : i32, i32
  }
  func.func @transform_5(%arg0: i32) -> (i32, i32) {
    %c0_i32 = arith.constant 0 : i32
    %c0_i32_0 = arith.constant 0 : i32
    %c0_i32_1 = arith.constant 0 : i32
    return %c0_i32, %c0_i32_0 : i32, i32
  }
  func.func @transform_6(%arg0: i32) -> (i32, i32) {
    %c0_i32 = arith.constant 0 : i32
    %c0_i32_0 = arith.constant 0 : i32
    %c0_i32_1 = arith.constant 0 : i32
    return %c0_i32, %c0_i32_0 : i32, i32
  }
  func.func @transform_7(%arg0: i32) -> (i32, i32) {
    %c0_i32 = arith.constant 0 : i32
    %c0_i32_0 = arith.constant 0 : i32
    %c0_i32_1 = arith.constant 0 : i32
    return %c0_i32, %c0_i32_0 : i32, i32
  }
  func.func @transform_8(%arg0: i32) -> (i32, i32) {
    %c0_i32 = arith.constant 0 : i32
    %c0_i32_0 = arith.constant 0 : i32
    %c0_i32_1 = arith.constant 0 : i32
    return %c0_i32, %c0_i32_0 : i32, i32
  }
  func.func @transform_9(%arg0: i32) -> (i32, i32) {
    %c0_i32 = arith.constant 0 : i32
    %c0_i32_0 = arith.constant 0 : i32
    %c0_i32_1 = arith.constant 0 : i32
    return %c0_i32, %c0_i32_0 : i32, i32
  }
  func.func @transform_10(%arg0: i32) -> (i32, i32, i32) {
    %c0_i32 = arith.constant 0 : i32
    %c0_i32_0 = arith.constant 0 : i32
    %c0_i32_1 = arith.constant 0 : i32
    return %arg0, %c0_i32, %c0_i32_0 : i32, i32, i32
  }
}

</mosaic_0001>

<bundles_post_ra>
// kernel: tpu_custom_call.1
= control target key start
LH: loop header
LB: loop body
LE: loop exit
PB: predicated region body
PF: predicated region fallthrough
CT: control target
= control target key end

     0   :  { %15 = vsyncpa [#allocation3], 0  ;;  %s1296_s0 = inlined_call_operand.vmem [shape: f32[2,16,256], index: 0, kind: input, shape index: {}]   ;;  %s1297_s1 = inlined_call_operand.hbm [shape: f32[2,16,256], index: 1, kind: input, shape index: {}]   ;;  %s1298_s2 = inlined_call_operand.vmem [shape: f32[4,16], index: 2, kind: input, shape index: {}]   ;;  %s1299_s3 = inlined_call_operand.vmem [shape: f32[4,1], index: 3, kind: input, shape index: {}]   ;;  %s1300_s4 = inlined_call_operand.vmem [shape: f32[16,4], index: 4, kind: input, shape index: {}]   ;;  %s1301_s5 = inlined_call_operand.vmem [shape: f32[16,1], index: 5, kind: input, shape index: {}]   ;;  %s1302_s6 = inlined_call_operand.vmem [shape: f32[16,4], index: 6, kind: input, shape index: {}]   ;;  %s1303_s7 = inlined_call_operand.vmem [shape: f32[1,4], index: 7, kind: input, shape index: {}]   ;;  %s1304_s8 = inlined_call_operand.vmem [shape: f32[16,4], index: 8, kind: input, shape index: {}]   ;;  %s1305_s9 = inlined_call_operand.vmem [shape: f32[16,1], index: 9, kind: input, shape index: {}]   ;;  %s1306_s10 = inlined_call_operand.hbm [shape: f32[2,16,256], index: 10, kind: output, shape index: {}]  }
   0x1   :  { %17 = vsyncpa [#allocation3 + $0x1], 0 }
   0x2   :  { %18 = vsyncpa [#allocation4], 0 }
   0x3   :  { %20 = vsyncpa [#allocation4 + $0x1], 0  ;;  %s1041_s13 = smov 0   ;;  %s1043_s14 = smov 0  }
   0x4   :  { %s1045_s15 = smov 0   ;;  %s1047_s16 = smov 0  }
   0x5 LB: > { %s1062_s17 = sadd.s32 4294967295, %s976_s16   ;;  %s782_s18 = sadd.s32 4294967294, %s976_s16   ;;  %s976_s16 = sphi %s1047_s16, %s1321_s16   ;;  %s972_s15 = sphi %s1045_s15, %s1320_s15   ;;  %s968_s14 = sphi %s1043_s14, %s1319_s14   ;;  %s964_s13 = sphi %s1041_s13, %s1318_s13  }
   0x6   : > { %s1066_s19 = sadd.s32 1, %s976_s16   ;;  %s59_s20 = sadd.s32 1, %s972_s15 }
   0x7   : > { %s56_s21 = ssub.s32 %s976_s16, %s1066_s19  ;;  %p66_p0 = scmp.ne.s32.totalorder %s972_s15, %s968_s14 }
   0x8   : > { %p57_p1 = scmp.eq.s32.totalorder %s56_s21, 0  ;;  %p67_p2 = scmp.eq.s32.totalorder %s976_s16, 0 }
   0x9   : > { %p72_p3 = scmp.ne.s32.totalorder %s968_s14, %s964_s13  ;;  %p73_p4 = scmp.eq.s32.totalorder %s1062_s17, 0 }
   0xa   : > { %s1078_s22 = scalar_select %p57_p1, %s972_s15, %s59_s20  }
   0xb   : > { %p1080_p5 = por %p67_p2, %p66_p0  ;;  %p1084_p6 = por %p73_p4, %p72_p3 }
   0xc   : > { %1308 = sst [smem:[#allocation8_spill]] %s1078_s22  ;;  %p264_p7 = scmp.eq.s32.totalorder %s1062_s17, 1 }
   0xd   : > { %p270_p8 = scmp.eq.s32.totalorder %s782_s18, 1  ;;  %p822_p10 = scmp.lt.s32.totalorder %s976_s16, 2 }
   0xe   : > { %p1091_p11 = por %p264_p7, %p66_p0  ;;  %s322_s27 = sand.u32 1, %s972_s15  }
   0xf   : > { %p1095_p12 = por %p270_p8, %p72_p3  ;;  %s803_s28 = sshll.u32 %s976_s16, 9 }
  0x10   : > { %s1311_s25 = scalar_select %p1091_p11, 1, 0 }
  0x11   : > { %s1312_s26 = scalar_select %p1095_p12, 1, 0 }
  0x12   : > { %s785_s29 = sshll.u32 %s322_s27, 5  ;;  %s1104_s12 = scalar_lea.hbm %s1297_s1, %s803_s28 }
  0x13   : > { %s326_s18 = scalar_lea.vmem [#allocation2], %s785_s29  ;;  %p1108_p13 = pnand %p822_p10, %p1080_p5 }
  0x14   : > { %s333_s20 = sshll.u32 %s326_s18, 4  ;;  %s1114_s22 = scalar_lea.sflag [#allocation3], %s322_s27  ;;  %s1112_s20 = int_to_ptr.vmem [resolvable:$true] %s333_s20 }
  0x15   : > { %s880_s30 = scalar_lea.hbm %s1104_s12, 512  ;;  %p882_p1 = pneg %p1108_p13 }
  0x16   : > { %p881_p0 = scmp.ne.s32.totalorder %s1104_s12, %s880_s30  ;;  %s885_s29 = scalar_lea.hbm %s1297_s1, 1024 }
  0x17   : > { %p886_p4 = scmp.lt.u32.totalorder %s1104_s12, %s1297_s1  ;;  %p887_p5 = scmp.lt.u32.totalorder %s885_s29, %s880_s30 }
  0x18   : > { %p883_p2 = pnand %p882_p1, %p881_p0  ;;  %p889_p8 = scmp.lt.u32.totalorder %s880_s30, %s1104_s12 }
  0x19   : > { %p888_p7 = por %p887_p5, %p886_p4 }
  0x1a   : > { %p884_p3 = pneg %p883_p2 }
  0x1b   : > { %p890_p10 = por %p889_p8, %p888_p7 }
  0x1d   : > { %p891_p9 = pnand %p890_p10, %p884_p3 }
  0x1f   : > { %894 = shalt.err (!%p891_p9)
}
  0x20   : > { %s895_s27 = scalar_lea.vmem %s1112_s20, 512  ;;  %s978_s28 = smov [#allocation2]  }
  0x21   : > { %p896_p0 = scmp.ne.s32.totalorder %s1112_s20, %s895_s27  ;;  %s900_s23 = sshll.u32 %s978_s28, 4  ;;  %s901_s23 = int_to_ptr.vmem [resolvable:$false] %s900_s23 }
  0x22   : > { %s902_s11 = scalar_lea.vmem %s901_s23, 1024  ;;  %p903_p11 = scmp.lt.s32.totalorder %s1112_s20, %s901_s23 }
  0x23   : > { %p898_p2 = pnand %p896_p0, %p882_p1  ;;  %p904_p4 = scmp.lt.s32.totalorder %s902_s11, %s895_s27 }
  0x25   : > { %p899_p12 = pneg %p898_p2  ;;  %p905_p5 = por %p904_p4, %p903_p11 }
  0x27   : > { %p906_p7 = pnand %p905_p5, %p899_p12 }
  0x29   : > { %909 = shalt.err (!%p906_p7)
}
  0x2a   : > { %s979_s30 = smov 256   ;;  %s980_s29 = smov 16  }
  0x2b   : > { %817 = dma.hbm_to_vmem [thread:$0]  (!%p1108_p13), %s1104_s12, 512, %s1112_s20, %s1114_s22, %s979_s30, %s979_s30, %s980_s29  }
  0x2c   : > { %p788_p9 = scmp.ge.s32.totalorder %s976_s16, 1  ;;  %p341_p1 = scmp.lt.s32.totalorder %s976_s16, 3 }
  0x2e   : > { %p342_p3 = pnand %p788_p9, %p341_p1 }
  0x2f   : > { %s1145_s18 = sand.u32 (!%p342_p3), 1, %s968_s14  }
  0x30   : > { %345 = sbr.rel (%p342_p3) target bundleno = 590 (0x24e), region = 60  ;;  %s789_s27 = sshll.u32 (!%p342_p3), %s1145_s18, 5 }
  0x31   : > { %s348_s28 = scalar_lea.sflag (!%p342_p3), [#allocation3], %s1145_s18  ;;  %s351_s23 = scalar_lea.vmem (!%p342_p3), [#allocation2], %s789_s27 }
  0x37   : > { %955 = dma.done.wait (%p1084_p6), %s348_s28, 512  }
  0x38   : > { %957 = vsyncadd (%p1084_p6), %s348_s28, 4294966784  ;;  %p393_p11 = scmp.lt.s32.totalorder %s1062_s17, 1  ;;  %v981_v0 = vmov 0   ;;  %v982_v1 = vmov 0.0   ;;  %v454_v2 = vld [vmem:[%s1299_s3] sm:$0xf]  ;;  %v437_v35 = vlaneseq }
  0x39   : > { %862 = vset.pattern.permute.xlu0 %v981_v0  ;;  %528 = vmatprep.mubr.f32.mxu0 %v982_v1  ;;  %v1169_v5 = vld [vmem:[%s351_s23 + $0x8] sm:$0xff]  ;;  %v1171_v6 = vld [vmem:[%s351_s23 + $0x18] sm:$0xff]  ;;  %v1181_v11 = vld [vmem:[%s351_s23] sm:$0xff]  ;;  %vm460_vm0 = vcmask 130048   ;;  %vm422_vm1 = vcmask 31744   ;;  %vm559_vm2 = vcmask 1043456  }
  0x3a   : > { %s394_s22 = scalar_select %p393_p11, %s1062_s17, 1  ;;  %630 = vmatprep.mubr.f32.mxu1 %v982_v1  ;;  %863 = vset.pattern.permute.xlu1 %v981_v0  ;;  %v1183_v12 = vld [vmem:[%s351_s23 + $0x10] sm:$0xff]  ;;  %v453_v18 = vld [vmem:[%s1298_s2] sm:$0xf]  ;;  %v419_v23 = vld [vmem:[%s1302_s6 + $0x8] sm:$0xff]  ;;  %v438_v38 = vshrl.u32 %v437_v35, 7 }
  0x3b   : > { %457 = vperm.xlu0 %862, %v454_v2   ;;  %v418_v25 = vld [vmem:[%s1302_s6] sm:$0xff]  ;;  %v436_v46 = vld [vmem:[%s1304_s8 + $0x8] sm:$0xff]  ;;  %s392_s20 = scalar_lea.vmem [#allocation5], %s789_s27  ;;  %p1314_p12 = scmp.ne.s32.totalorder %s1311_s25, 0 }
  0x3c   : > { %s804_s12 = sshll.u32 %s394_s22, 5  ;;  %v432_v39 = vld [vmem:[%s1303_s7] sm:$0x1]  ;;  %v439_v42 = vsub.s32 0, %v438_v38  ;;  %v538_v58 = vld [vmem:[%s1300_s4 + $0x8] sm:$0xff]  ;;  %s697_s21 = sshll.u32 %s392_s20, 4  ;;  %s1252_s21 = int_to_ptr.vmem [resolvable:$true] %s697_s21 }
  0x3d   : > { %s397_s11 = scalar_lea.vmem %s1296_s0, %s804_s12  ;;  %v435_v44 = vld [vmem:[%s1304_s8] sm:$0xff]  ;;  %v450_v63 = vld [vmem:[%s1305_s9 + $0x8] sm:$0xff]  ;;  %s805_s12 = sshll.u32 %s1062_s17, 9 }
  0x3e   : > { %v1165_v3 = vld [vmem:[%s397_s11 + $0x8] sm:$0xff]  ;;  %v1167_v4 = vld [vmem:[%s397_s11 + $0x18] sm:$0xff]  ;;  %v1173_v7 = vld [vmem:[%s397_s11] sm:$0xff]  ;;  %s1250_s24 = scalar_lea.hbm %s1306_s10, %s805_s12  ;;  %s684_s17 = scalar_lea.sflag [#allocation4], %s1145_s18 }
  0x3f   : > { %v407_v8 = vadd.f32 %v1169_v5, %v1165_v3  ;;  %v409_v9 = vadd.f32 %v1171_v6, %v1167_v4  ;;  %v1179_v10 = vld [vmem:[%s397_s11 + $0x10] sm:$0xff]  ;;  %v406_v13 = vadd.f32 %v1181_v11, %v1173_v7  ;;  %v537_v57 = vld [vmem:[%s1300_s4] sm:$0xff]  ;;  %s910_s27 = scalar_lea.vmem %s1252_s21, 512  ;;  %s983_s29 = smov [#allocation5]  }
  0x40   : > { %v408_v14 = vadd.f32 %v1183_v12, %v1179_v10  ;;  %v449_v59 = vld [vmem:[%s1305_s9] sm:$0xff]  ;;  %p911_p6 = scmp.ne.s32.totalorder %s1252_s21, %s910_s27  ;;  %s914_s28 = sshll.u32 %s983_s29, 4  ;;  %s915_s28 = int_to_ptr.vmem [resolvable:$false] %s914_s28 }
  0x41   : > { %v806_v15 = vpack.c.bf16 %v409_v9, %v407_v8  ;;  %v410_v19 = vadd.f32 %v407_v8, %v406_v13  ;;  %v539_v60 = vld [vmem:[%s1301_s5] sm:$0xff]  ;;  %s916_s23 = scalar_lea.vmem %s915_s28, 1024  ;;  %p917_p10 = scmp.lt.s32.totalorder %s1252_s21, %s915_s28 }
  0x42   : > { %v808_v16 = vpack.c.bf16 %v408_v14, %v406_v13  ;;  %v413_v17 = vadd.f32 %v409_v9, %v408_v14  ;;  %p912_p13 = pnand %p911_p6, %p1314_p12  ;;  %p918_p0 = scmp.lt.s32.totalorder %s916_s23, %s910_s27 }
  0x43   : > { %807 = vmatprep.subr.bf16.mxu0 %v806_v15 }
  0x44   : > { %809 = vmatpush1.bf16.msra.mxu0 %v808_v16  ;;  %414 = vadd.xlane.f32.xlu1 %v413_v17  ;;  %p913_p8 = pneg %p912_p13  ;;  %p919_p2 = por %p918_p0, %p917_p10 }
  0x46   : > { %p920_p4 = pnand %p919_p2, %p913_p8 }
  0x47   : > { %793 = vmatmul.mubr.msk.f32.vlgmr.msra.gmra.mrb[0].mxu0 %vm460_vm0, %v453_v18 }
  0x5a   : > { %411 = vadd.xlane.f32.xlu0 %v410_v19 }
  0xba   : > { %v458_v22 = vpop.permute.xlu0 %457 }
  0xd1   : > { %v415_v20 = vpop.xlane.xlu1 %414 }
  0xd2   : > { %v417_v21 = vmul.f32 0.00390625, %v415_v20 }
  0xd4   : > { %v421_v24 = vmul.f32 %v419_v23, %v417_v21 }
  0xd6   : > { %v424_v28 = vsel %vm422_vm1, %v421_v24, 0.0 }
  0xe7   : > { %v412_v26 = vpop.xlane.xlu0 %411 }
  0xe8   : > { %v416_v27 = vmul.f32 0.00390625, %v412_v26 }
  0xea   : > { %v420_v29 = vmul.f32 %v418_v25, %v416_v27 }
  0xec   : > { %v423_v30 = vsel %vm422_vm1, %v420_v29, 0.0 }
  0xed   : > { %v425_v31 = vadd.f32 %v424_v28, %v423_v30 }
  0xef   : > { %v426_v32 = vrot.slane %v425_v31, 4 }
  0xf1   : > { %v427_v33 = vadd.f32 %v426_v32, %v425_v31 }
  0xf3   : > { %v428_v34 = vrot.slane %v427_v33, 2 }
  0xf5   : > { %v429_v36 = vadd.f32 %v428_v34, %v427_v33 }
  0xf7   : > { %v430_v37 = vrot.slane %v429_v36, 1 }
  0xf9   : > { %v431_v40 = vadd.f32 %v430_v37, %v429_v36 }
  0xfb   : > { %v433_v41 = vadd.f32 %v432_v39, %v431_v40  ;;  %v663_v39 = vsub.f32 %v1173_v7, %v1181_v11  ;;  %v664_v40 = vsub.f32 %v1165_v3, %v1169_v5 }
  0xfd   : > { %v434_v43 = vmax.f32 %v433_v41, 0.0 }
  0xff   : > { %v440_v45 = vrot.slane %v434_v43, %v439_v42  ;;  %v665_v43 = vsub.f32 %v1179_v10, %v1183_v12 }
 0x101   : > { %v441_v47 = vmul.f32 %v440_v45, %v435_v44  ;;  %v442_v49 = vmul.f32 %v440_v45, %v436_v46  ;;  %v666_v45 = vsub.f32 %v1167_v4, %v1171_v6 }
 0x103   : > { %v443_v48 = vsel %vm422_vm1, %v441_v47, 0.0  ;;  %v446_v50 = vsel %vm422_vm1, %v442_v49, 0.0 }
 0x104   : > { %444 = vadd.xlane.f32.xlu1 %v443_v48 }
 0x108   : > { %447 = vadd.xlane.f32.xlu1 %v446_v50 }
 0x11a   : > { %v530_v51 = vpop.f32.mrb[0].mxu0 }
 0x11b   : > { %v531_v52 = vadd.f32 %v530_v51, %v458_v22  ;;  %v532_v53 = vpop.f32.mrb[1].mxu0 }
 0x11c   : > { %v533_v54 = vadd.f32 %v532_v53, %v458_v22 }
 0x11d   : > { %v535_v56 = vmax.f32 %v531_v52, 0.0 }
 0x11e   : > { %v536_v55 = vmax.f32 %v533_v54, 0.0 }
 0x120   : > { %794 = vmatprep.subr.msk.mxu1 %vm559_vm2, %v536_v55 }
 0x121   : > { %795 = vmatpush1.msk.msra.mxu1 %vm559_vm2, %v535_v56 }
 0x122   : > { %796 = vmatmul.mubr.msk.f32.vlgmr.msra.gmra.mrb[0].mxu1 %vm422_vm1, %v537_v57 }
 0x123   : > { %636 = vmatprep.mubr.f32.mxu1 %v982_v1  ;;  %v540_v1 = vld [vmem:[%s1301_s5 + $0x8] sm:$0xff] }
 0x126   : > { %797 = vmatmul.mubr.msk.f32.gmra.mrb[2].mxu1 %vm422_vm1, %v538_v58 }
 0x191   : > { %v445_v61 = vpop.xlane.xlu1 %444 }
 0x192   : > { %v451_v62 = vadd.f32 %v449_v59, %v445_v61 }
 0x194   : > { %v541_v0 = vadd.f32 %v539_v60, %v451_v62 }
 0x195   : > { %v448_v2 = vpop.xlane.xlu1 %447 }
 0x196   : > { %v452_v8 = vadd.f32 %v450_v63, %v448_v2  ;;  %545 = vperm.xlu1 %863, %v541_v0  }
 0x198   : > { %v542_v9 = vadd.f32 %v540_v1, %v452_v8 }
 0x19a   : > { %550 = vperm.xlu1 %863, %v542_v9  }
 0x1f5   : > { %v632_v13 = vpop.f32.mrb[0].mxu1 }
 0x1f6   : > { %v634_v14 = vpop.f32.mrb[1].mxu1 }
 0x1f9   : > { %v638_v15 = vpop.f32.mrb[2].mxu1 }
 0x1fa   : > { %v640_v16 = vpop.f32.mrb[3].mxu1 }
 0x215   : > { %v546_v17 = vpop.permute.xlu1 %545 }
 0x216   : > { %v633_v18 = vadd.f32 %v632_v13, %v546_v17  ;;  %v635_v19 = vadd.f32 %v634_v14, %v546_v17 }
 0x218   : > { %v643_v20 = vsub.f32 0.0, %v633_v18  ;;  %v644_v21 = vsub.f32 0.0, %v635_v19 }
 0x219   : > { %v551_v22 = vpop.permute.xlu1 %550 }
 0x21a   : > { %v647_v23 = vmul.f32 1.442695, %v643_v20  ;;  %v649_v24 = vmul.f32 1.442695, %v644_v21  ;;  %v639_v25 = vadd.f32 %v638_v15, %v551_v22  ;;  %v641_v26 = vadd.f32 %v640_v16, %v551_v22 }
 0x21c   : > { %864 = vpow2.f32 %v647_v23  ;;  %v645_v27 = vsub.f32 0.0, %v639_v25  ;;  %v646_v28 = vsub.f32 0.0, %v641_v26 }
 0x21d   : > { %866 = vpow2.f32 %v649_v24 }
 0x21e   : > { %v651_v29 = vmul.f32 1.442695, %v645_v27  ;;  %v653_v30 = vmul.f32 1.442695, %v646_v28 }
 0x220   : > { %868 = vpow2.f32 %v651_v29 }
 0x221   : > { %870 = vpow2.f32 %v653_v30 }
 0x226   : > { %v865_v31 = vpop.eup %864 }
 0x227   : > { %v867_v32 = vpop.eup %866  ;;  %v655_v33 = vadd.f32 1.0, %v865_v31 }
 0x228   : > { %v656_v34 = vadd.f32 1.0, %v867_v32 }
 0x229   : > { %872 = vrcp.f32 %v655_v33 }
 0x22a   : > { %v869_v35 = vpop.eup %868  ;;  %874 = vrcp.f32 %v656_v34 }
 0x22b   : > { %v871_v36 = vpop.eup %870  ;;  %v657_v37 = vadd.f32 1.0, %v869_v35 }
 0x22c   : > { %v658_v38 = vadd.f32 1.0, %v871_v36 }
 0x22d   : > { %876 = vrcp.f32 %v657_v37 }
 0x22e   : > { %878 = vrcp.f32 %v658_v38 }
 0x233   : > { %v873_v41 = vpop.eup %872 }
 0x234   : > { %v875_v42 = vpop.eup %874  ;;  %v667_v44 = vmul.f32 %v873_v41, %v663_v39 }
 0x235   : > { %v668_v46 = vmul.f32 %v875_v42, %v664_v40 }
 0x236   : > { %v671_v47 = vadd.f32 %v667_v44, %v1181_v11 }
 0x237   : > { %v877_v48 = vpop.eup %876  ;;  %v672_v7 = vadd.f32 %v668_v46, %v1169_v5 }
 0x238   : > { %v879_v49 = vpop.eup %878  ;;  %v675_v50 = vmul.f32 2.0, %v671_v47  ;;  %v669_v51 = vmul.f32 %v877_v48, %v665_v43 }
 0x239   : > { %v676_v3 = vmul.f32 2.0, %v672_v7  ;;  %v670_v52 = vmul.f32 %v879_v49, %v666_v45 }
 0x23a   : > { %v673_v10 = vadd.f32 %v669_v51, %v1183_v12  ;;  %679 = vst [vmem:[%s392_s20] sm:$0xff] %v675_v50 }
 0x23b   : > { %v674_v4 = vadd.f32 %v670_v52, %v1171_v6  ;;  %680 = vst [vmem:[%s392_s20 + $0x8] sm:$0xff] %v676_v3 }
 0x23c   : > { %v677_v11 = vmul.f32 2.0, %v673_v10 }
 0x23d   : > { %v678_v5 = vmul.f32 2.0, %v674_v4 }
 0x23e   : > { %681 = vst [vmem:[%s392_s20 + $0x10] sm:$0xff] %v677_v11 }
 0x23f   : > { %682 = vst [vmem:[%s392_s20 + $0x18] sm:$0xff] %v678_v5 }
 0x240   : > { %923 = shalt.err (!%p920_p4)
}
 0x241   : > { %s924_s22 = scalar_lea.hbm %s1250_s24, 512  ;;  %s928_s11 = scalar_lea.hbm %s1306_s10, 1024 }
 0x242   : > { %p925_p5 = scmp.ne.s32.totalorder %s1250_s24, %s924_s22  ;;  %p929_p1 = scmp.lt.u32.totalorder %s1250_s24, %s1306_s10 }
 0x243   : > { %p930_p3 = scmp.lt.u32.totalorder %s928_s11, %s924_s22  ;;  %p932_p6 = scmp.lt.u32.totalorder %s924_s22, %s1250_s24 }
 0x244   : > { %p926_p7 = pnand %p925_p5, %p1314_p12 }
 0x245   : > { %p931_p11 = por %p930_p3, %p929_p1 }
 0x246   : > { %p927_p9 = pneg %p926_p7 }
 0x247   : > { %p933_p13 = por %p932_p6, %p931_p11 }
 0x249   : > { %p934_p8 = pnand %p933_p13, %p927_p9 }
 0x24b   : > { %937 = shalt.err (!%p934_p8)
}
 0x24c   : > { %s984_s27 = smov 256   ;;  %s985_s28 = smov 16  }
 0x24d   : > { %812 = dma.vmem_to_hbm [thread:$0]  (%p1314_p12), %s1252_s21, 512, %s1250_s24, %s684_s17, %s984_s27, %s984_s27, %s985_s28  }
 0x24e PF: > { %s712_s23 = sand.u32 1, %s964_s13   ;;  %p1315_p10 = scmp.ne.s32.totalorder %s1312_s26, 0 }
 0x24f   : > { %p1316_p0 = scmp.ge.s32.totalorder %s976_s16, 2  ;;  %s713_s22 = scalar_lea.sflag [#allocation4], %s712_s23 }
 0x251   : > { %p819_p2 = pnand %p1316_p0, %p1315_p10 }
 0x253   : > { %959 = dma.done.wait (!%p819_p2), %s713_s22, 512  }
 0x254   : > { %961 = vsyncadd (!%p819_p2), %s713_s22, 4294966784  ;;  %s1317_s12 = sld [smem:[#allocation8_spill]]  ;;  %p23_p4 = scmp.ge.s32.totalorder %s1066_s19, 4  }
 0x255   : > { %s1318_s13 = smov %s968_s14  ;;  %s1319_s14 = smov %s972_s15 }
 0x256   : > { %s1321_s16 = smov %s1066_s19  ;;  %25 = sbr.rel (!%p23_p4) target bundleno = 5 (0x5), region = 108 }
 0x25a   : > { %s1320_s15 = smov %s1317_s12 }
 0x25d   :  { %718 = vsyncpa [#allocation3], 1 }
 0x25e   :  { %720 = vsyncpa [#allocation3 + $0x1], 1 }
 0x25f   :  { %721 = vsyncpa [#allocation4], 1 }
 0x260   :  { %723 = vsyncpa [#allocation4 + $0x1], 1 }

</bundles_post_ra>
